<compile_context>
chip_gen: v7x
topology: tpu7x:2x2x1
jax: 0.10.0
libtpu: 0.0.40
codegen_flags: <defaults>
</compile_context>

<pallas_src>
import functools

import jax
import jax.numpy as jnp
from jax.experimental import pallas as pl
from jax.experimental.pallas import tpu as pltpu


def _round_up(x, m):
    return (x + m - 1) // m * m


# Safe on every generation: <= default-raise-able scoped VMEM on v5e/v6e
# (128 MiB physical) and leaves headroom on v7x (64 MiB physical).
_MOSAIC_VMEM = 48 * 1024 * 1024


# ----------------------------------------------------------------------------
# Kernel 1: tiled bf16 matmul with fused per-channel affine + LeakyReLU epilogue
# ----------------------------------------------------------------------------
def _mm_epilogue_kernel(a_ref, b_ref, scale_ref, shift_ref, o_ref, *, slope):
    @pl.when(pl.program_id(2) == 0)
    def _():
        o_ref[...] = jnp.zeros_like(o_ref)

    o_ref[...] += jnp.dot(a_ref[...], b_ref[...],
                          preferred_element_type=jnp.float32)

    @pl.when(pl.program_id(2) == pl.num_programs(2) - 1)
    def _():
        y = o_ref[...] * scale_ref[...] + shift_ref[...]
        o_ref[...] = jnp.where(y >= 0.0, y, slope * y)


def pallas_matmul_fused(a, b, scale, shift, slope,
                        tm_max=256, tn_max=256, tk_max=512):
    """act((a @ b) * scale + shift).  a, b fed to the MXU as bf16; f32 accum."""
    M, K = a.shape
    K2, N = b.shape
    assert K == K2
    tm = min(tm_max, _round_up(M, 16))
    tn = min(tn_max, _round_up(N, 128))
    tk = min(tk_max, _round_up(K, 128))
    Mp, Kp, Np = _round_up(M, tm), _round_up(K, tk), _round_up(N, tn)

    a_p = a.astype(jnp.bfloat16)
    if (Mp, Kp) != (M, K):
        a_p = jnp.pad(a_p, ((0, Mp - M), (0, Kp - K)))
    b_p = b.astype(jnp.bfloat16)
    if (Kp, Np) != (K, N):
        b_p = jnp.pad(b_p, ((0, Kp - K), (0, Np - N)))
    sc = scale.reshape(1, N).astype(jnp.float32)
    sh = shift.reshape(1, N).astype(jnp.float32)
    if Np != N:
        sc = jnp.pad(sc, ((0, 0), (0, Np - N)), constant_values=1.0)
        sh = jnp.pad(sh, ((0, 0), (0, Np - N)))

    out = pl.pallas_call(
        functools.partial(_mm_epilogue_kernel, slope=float(slope)),
        out_shape=jax.ShapeDtypeStruct((Mp, Np), jnp.float32),
        grid_spec=pltpu.PrefetchScalarGridSpec(
            num_scalar_prefetch=0,
            grid=(Mp // tm, Np // tn, Kp // tk),
            in_specs=[pl.BlockSpec((tm, tk), lambda i, j, k: (i, k)),
                      pl.BlockSpec((tk, tn), lambda i, j, k: (k, j)),
                      pl.BlockSpec((1, tn), lambda i, j, k: (0, j)),
                      pl.BlockSpec((1, tn), lambda i, j, k: (0, j))],
            out_specs=pl.BlockSpec((tm, tn), lambda i, j, k: (i, j))),
        compiler_params=pltpu.CompilerParams(
            dimension_semantics=("parallel", "parallel", "arbitrary"),
            vmem_limit_bytes=_MOSAIC_VMEM),
    )(a_p, b_p, sc, sh)
    return out[:M, :N]


# ----------------------------------------------------------------------------
# Kernel 2: matrix-vector product (Cout == 1 conv) on the VPU — no MXU padding
# ----------------------------------------------------------------------------
def _matvec_kernel(a_ref, w_ref, o_ref):
    @pl.when(pl.program_id(1) == 0)
    def _():
        o_ref[...] = jnp.zeros_like(o_ref)
    a = a_ref[...].astype(jnp.float32)
    w = w_ref[...]
    o_ref[...] += jnp.sum(a * w, axis=1, keepdims=True)


def pallas_matvec(a, w):
    """a: (M, K) bf16/f32, w: (1, K) f32 -> (M, 1) f32."""
    M, K = a.shape
    tm = min(512, _round_up(M, 16))
    tk = min(2048, _round_up(K, 128))
    Mp, Kp = _round_up(M, tm), _round_up(K, tk)
    a_p = a
    if (Mp, Kp) != (M, K):
        a_p = jnp.pad(a_p, ((0, Mp - M), (0, Kp - K)))
    w_p = w.astype(jnp.float32)
    if Kp != K:
        w_p = jnp.pad(w_p, ((0, 0), (0, Kp - K)))
    out = pl.pallas_call(
        _matvec_kernel,
        out_shape=jax.ShapeDtypeStruct((Mp, 1), jnp.float32),
        grid=(Mp // tm, Kp // tk),
        in_specs=[pl.BlockSpec((tm, tk), lambda i, k: (i, k)),
                  pl.BlockSpec((1, tk), lambda i, k: (0, k))],
        out_specs=pl.BlockSpec((tm, 1), lambda i, k: (i, 0)),
        compiler_params=pltpu.CompilerParams(
            dimension_semantics=("parallel", "arbitrary"),
            vmem_limit_bytes=_MOSAIC_VMEM),
    )(a_p, w_p)
    return out[:M]


# ----------------------------------------------------------------------------
# Kernel 3: row-tiled per-channel affine + LeakyReLU (BatchNorm application)
# ----------------------------------------------------------------------------
def _affine_lrelu_kernel(x_ref, scale_ref, shift_ref, o_ref, *, slope):
    y = x_ref[...] * scale_ref[...] + shift_ref[...]
    o_ref[...] = jnp.where(y >= 0.0, y, slope * y)


def affine_lrelu(x, scale, shift, slope):
    M, C = x.shape
    TM = min(1024, _round_up(M, 8))
    Mp = _round_up(M, TM)
    xp = x.astype(jnp.float32)
    if Mp != M:
        xp = jnp.pad(xp, ((0, Mp - M), (0, 0)))
    sc = scale.reshape(1, C).astype(jnp.float32)
    sh = shift.reshape(1, C).astype(jnp.float32)
    out = pl.pallas_call(
        functools.partial(_affine_lrelu_kernel, slope=float(slope)),
        out_shape=jax.ShapeDtypeStruct((Mp, C), jnp.float32),
        grid=(Mp // TM,),
        in_specs=[pl.BlockSpec((TM, C), lambda i: (i, 0)),
                  pl.BlockSpec((1, C), lambda i: (0, 0)),
                  pl.BlockSpec((1, C), lambda i: (0, 0))],
        out_specs=pl.BlockSpec((TM, C), lambda i: (i, 0)),
        compiler_params=pltpu.CompilerParams(
            dimension_semantics=("parallel",),
            vmem_limit_bytes=_MOSAIC_VMEM),
    )(xp, sc, sh)
    return out[:M]


# ----------------------------------------------------------------------------
# Kernel 4: single-pass per-channel sum and sum-of-squares (BatchNorm stats)
# ----------------------------------------------------------------------------
def _chan_stats_kernel(x_ref, sum_ref, sq_ref):
    @pl.when(pl.program_id(0) == 0)
    def _():
        sum_ref[...] = jnp.zeros_like(sum_ref)
        sq_ref[...] = jnp.zeros_like(sq_ref)
    x = x_ref[...]
    sum_ref[...] += jnp.sum(x, axis=0, keepdims=True)
    sq_ref[...] += jnp.sum(x * x, axis=0, keepdims=True)


def channel_sums(x):
    M, C = x.shape
    TM = min(1024, _round_up(M, 8))
    Mp = _round_up(M, TM)
    xp = x.astype(jnp.float32)
    if Mp != M:
        xp = jnp.pad(xp, ((0, Mp - M), (0, 0)))
    s, ss = pl.pallas_call(
        _chan_stats_kernel,
        out_shape=(jax.ShapeDtypeStruct((1, C), jnp.float32),
                   jax.ShapeDtypeStruct((1, C), jnp.float32)),
        grid=(Mp // TM,),
        in_specs=[pl.BlockSpec((TM, C), lambda i: (i, 0))],
        out_specs=(pl.BlockSpec((1, C), lambda i: (0, 0)),
                   pl.BlockSpec((1, C), lambda i: (0, 0))),
        compiler_params=pltpu.CompilerParams(
            dimension_semantics=("arbitrary",),
            vmem_limit_bytes=_MOSAIC_VMEM),
    )(xp)
    return s, ss


# ----------------------------------------------------------------------------
# Kernel 5: tiled sum of |x - y| over the whole tensor (pixel L1 term)
# ----------------------------------------------------------------------------
def _absdiff_kernel(x_ref, y_ref, o_ref):
    @pl.when(pl.program_id(0) == 0)
    def _():
        o_ref[...] = jnp.zeros_like(o_ref)
    o_ref[...] += jnp.sum(jnp.abs(x_ref[...] - y_ref[...]),
                          axis=(0, 1), keepdims=True)


def abs_diff_sum(x, y):
    xf = x.reshape(-1).astype(jnp.float32)
    yf = y.reshape(-1).astype(jnp.float32)
    n = xf.shape[0]
    L = 512
    R = pl.cdiv(n, L)
    TR = min(1024, _round_up(R, 8))
    Rp = _round_up(R, TR)
    total = Rp * L
    if total != n:
        xf = jnp.pad(xf, (0, total - n))
        yf = jnp.pad(yf, (0, total - n))
    x2 = xf.reshape(Rp, L)
    y2 = yf.reshape(Rp, L)
    out = pl.pallas_call(
        _absdiff_kernel,
        out_shape=jax.ShapeDtypeStruct((1, 1), jnp.float32),
        grid=(Rp // TR,),
        in_specs=[pl.BlockSpec((TR, L), lambda i: (i, 0)),
                  pl.BlockSpec((TR, L), lambda i: (i, 0))],
        out_specs=pl.BlockSpec((1, 1), lambda i: (0, 0)),
        compiler_params=pltpu.CompilerParams(
            dimension_semantics=("arbitrary",),
            vmem_limit_bytes=_MOSAIC_VMEM),
    )(x2, y2)
    return out[0, 0]


# ----------------------------------------------------------------------------
# Kernel 6: per-sample KL of a diagonal Gaussian vs N(0, I), tiled over D
# ----------------------------------------------------------------------------
def _kl_kernel(mu_ref, lv_ref, o_ref):
    @pl.when(pl.program_id(0) == 0)
    def _():
        o_ref[...] = jnp.zeros_like(o_ref)
    mu = mu_ref[...]
    lv = lv_ref[...]
    o_ref[...] += 0.5 * jnp.sum(mu * mu + jnp.exp(lv) - 1.0 - lv,
                                axis=1, keepdims=True)


def kl_per_sample(mean, logvar):
    N = mean.shape[0]
    mu = mean.reshape(N, -1).astype(jnp.float32)
    lv = logvar.reshape(N, -1).astype(jnp.float32)
    D = mu.shape[1]
    TD = min(2048, _round_up(D, 128))
    Dp = _round_up(D, TD)
    if Dp != D:
        mu = jnp.pad(mu, ((0, 0), (0, Dp - D)))
        lv = jnp.pad(lv, ((0, 0), (0, Dp - D)))
    out = pl.pallas_call(
        _kl_kernel,
        out_shape=jax.ShapeDtypeStruct((N, 1), jnp.float32),
        grid=(Dp // TD,),
        in_specs=[pl.BlockSpec((N, TD), lambda d: (0, d)),
                  pl.BlockSpec((N, TD), lambda d: (0, d))],
        out_specs=pl.BlockSpec((N, 1), lambda d: (0, 0)),
        compiler_params=pltpu.CompilerParams(
            dimension_semantics=("arbitrary",),
            vmem_limit_bytes=_MOSAIC_VMEM),
    )(mu, lv)
    return out[:, 0]


# ----------------------------------------------------------------------------
# Kernel 7: fused LPIPS stage tail (L2-normalize, sqdiff, lin weighting, mean)
# ----------------------------------------------------------------------------
def _lpips_tail_kernel(fx_ref, fy_ref, lin_ref, o_ref, *, inv_count):
    @pl.when(pl.program_id(0) == 0)
    def _():
        o_ref[...] = jnp.zeros_like(o_ref)
    a = fx_ref[...]
    b = fy_ref[...]
    na = a * jax.lax.rsqrt(jnp.sum(a * a, axis=-1, keepdims=True) + 1e-10)
    nb = b * jax.lax.rsqrt(jnp.sum(b * b, axis=-1, keepdims=True) + 1e-10)
    d = (na - nb) ** 2
    w = d * lin_ref[...]
    part = jnp.sum(jnp.sum(w, axis=-1), axis=-1, keepdims=True)   # (N, 1)
    o_ref[...] += part * inv_count


def lpips_stage(fx, fy, lin):
    N, OH, OW, C = fx.shape
    S = OH * OW
    a = fx.reshape(N, S, C).astype(jnp.float32)
    b = fy.reshape(N, S, C).astype(jnp.float32)
    TS = min(512, _round_up(S, 8))
    Sp = _round_up(S, TS)
    if Sp != S:
        a = jnp.pad(a, ((0, 0), (0, Sp - S), (0, 0)))
        b = jnp.pad(b, ((0, 0), (0, Sp - S), (0, 0)))
    lin3 = lin.reshape(1, 1, C).astype(jnp.float32)
    out = pl.pallas_call(
        functools.partial(_lpips_tail_kernel, inv_count=1.0 / float(S)),
        out_shape=jax.ShapeDtypeStruct((N, 1), jnp.float32),
        grid=(Sp // TS,),
        in_specs=[pl.BlockSpec((N, TS, C), lambda s: (0, s, 0)),
                  pl.BlockSpec((N, TS, C), lambda s: (0, s, 0)),
                  pl.BlockSpec((1, 1, C), lambda s: (0, 0, 0))],
        out_specs=pl.BlockSpec((N, 1), lambda s: (0, 0)),
        compiler_params=pltpu.CompilerParams(
            dimension_semantics=("arbitrary",),
            vmem_limit_bytes=_MOSAIC_VMEM),
    )(a, b, lin3)
    return out  # (N, 1)


# ----------------------------------------------------------------------------
# Convolution = bf16 im2col (pure JAX glue) + fused Pallas matmul
# ----------------------------------------------------------------------------
def _im2col(x, kh, kw, stride, pad):
    # x: NHWC.  Patches are produced in bf16 to halve HBM traffic.
    x = x.astype(jnp.bfloat16)
    N, H, W, C = x.shape
    xp = jnp.pad(x, ((0, 0), (pad, pad), (pad, pad), (0, 0)))
    OH = (H + 2 * pad - kh) // stride + 1
    OW = (W + 2 * pad - kw) // stride + 1
    cols = []
    for i in range(kh):
        for j in range(kw):
            cols.append(xp[:, i:i + stride * OH:stride,
                           j:j + stride * OW:stride, :])
    patches = jnp.stack(cols, axis=3)  # N, OH, OW, KH*KW, C
    return patches.reshape(N * OH * OW, kh * kw * C), (N, OH, OW)


def conv2d_fused(x, w_oihw, stride, pad, scale, shift, slope):
    """Conv (NHWC) with fused `act(out*scale + shift)` epilogue."""
    Cout, Cin, KH, KW = w_oihw.shape
    patches, (N, OH, OW) = _im2col(x, KH, KW, stride, pad)
    w2 = jnp.transpose(w_oihw, (2, 3, 1, 0)).reshape(KH * KW * Cin, Cout)
    out = pallas_matmul_fused(patches, w2, scale, shift, slope)
    return out, (N, OH, OW)


def conv2d_cout1(x, w_oihw, stride, pad):
    """Conv with a single output channel: VPU multiply + lane reduction."""
    Cout, Cin, KH, KW = w_oihw.shape
    assert Cout == 1
    patches, (N, OH, OW) = _im2col(x, KH, KW, stride, pad)
    w = jnp.transpose(w_oihw, (2, 3, 1, 0)).reshape(1, KH * KW * Cin)
    out = pallas_matvec(patches, w)  # (M, 1)
    return out, (N, OH, OW)


# ----------------------------------------------------------------------------
# NLayerDiscriminator (PatchGAN): k4 convs, BatchNorm (train-mode batch stats),
# LeakyReLU(0.2).  weights_init: Conv ~ N(0, 0.02), BN gamma ~ N(1, 0.02).
# ----------------------------------------------------------------------------
def init_discriminator_params(key, input_nc=3, ndf=64, n_layers=3):
    cfgs = [(input_nc, ndf, 2, True, False)]
    nf_mult = 1
    for n in range(1, n_layers):
        prev, nf_mult = nf_mult, min(2 ** n, 8)
        cfgs.append((ndf * prev, ndf * nf_mult, 2, False, True))
    prev, nf_mult = nf_mult, min(2 ** n_layers, 8)
    cfgs.append((ndf * prev, ndf * nf_mult, 1, False, True))
    cfgs.append((ndf * nf_mult, 1, 1, True, False))

    params = []
    for cin, cout, stride, use_bias, use_bn in cfgs:
        key, k1, k2 = jax.random.split(key, 3)
        w = 0.02 * jax.random.normal(k1, (cout, cin, 4, 4), jnp.float32)
        b = jnp.zeros((cout,), jnp.float32) if use_bias else None
        if use_bn:
            gamma = 1.0 + 0.02 * jax.random.normal(k2, (cout,), jnp.float32)
            beta = jnp.zeros((cout,), jnp.float32)
        else:
            gamma = beta = None
        params.append(dict(w=w, b=b, gamma=gamma, beta=beta, stride=stride))
    return params


def discriminator_forward(params, x_groups):
    """x_groups: list of NHWC batches with identical shapes.

    Convolutions run on the concatenated batch (better MXU occupancy, one
    im2col pass); BatchNorm batch statistics are computed *per group* so the
    result matches running the torch discriminator separately on each input.
    Returns a list of logits (one per group), NHWC with C == 1.
    """
    G = len(x_groups)
    n_per = x_groups[0].shape[0]
    h = x_groups[0] if G == 1 else jnp.concatenate(x_groups, axis=0)
    n_total = len(params)
    for idx, p in enumerate(params):
        Cout = p['w'].shape[0]
        is_last = (idx == n_total - 1)
        if is_last:
            # Final Cout=1 conv, bias, no activation.
            out, (NB, OH, OW) = conv2d_cout1(h, p['w'], p['stride'], 1)
            out = out + p['b'][0]
            C = 1
        elif p['gamma'] is None:
            # bias + LeakyReLU(0.2) fused into the matmul epilogue.
            out, (NB, OH, OW) = conv2d_fused(
                h, p['w'], p['stride'], 1,
                jnp.ones((Cout,), jnp.float32), p['b'], 0.2)
            C = Cout
        else:
            # Raw conv, then per-group BatchNorm (train-mode, biased var)
            # + LeakyReLU(0.2).
            out, (NB, OH, OW) = conv2d_fused(
                h, p['w'], p['stride'], 1,
                jnp.ones((Cout,), jnp.float32), jnp.zeros((Cout,), jnp.float32),
                1.0)
            C = Cout
            m_g = (NB // G) * OH * OW
            parts = []
            for g in range(G):
                sl = out[g * m_g:(g + 1) * m_g]
                s, ss = channel_sums(sl)
                mean = s[0] / m_g
                var = ss[0] / m_g - mean * mean
                scale = p['gamma'] * jax.lax.rsqrt(var + 1e-5)
                shift = p['beta'] - mean * scale
                parts.append(affine_lrelu(sl, scale, shift, 0.2))
            out = parts[0] if G == 1 else jnp.concatenate(parts, axis=0)
        h = out.reshape(NB, OH, OW, C)
    return [h[g * n_per:(g + 1) * n_per] for g in range(G)]


# ----------------------------------------------------------------------------
# Synthetic LPIPS: same computational structure (scaling layer -> conv trunk ->
# channel-normalize -> squared diff -> 1x1 lin -> spatial avg -> sum over
# stages) with deterministic synthetic weights.
# TODO(synk): real LPIPS uses a pretrained VGG16 trunk + learned lin layers.
# ----------------------------------------------------------------------------
_LPIPS_SHIFT = jnp.array([-0.030, -0.088, -0.188], jnp.float32)
_LPIPS_SCALE = jnp.array([0.458, 0.448, 0.450], jnp.float32)


def init_lpips_params(key):
    cfgs = [(3, 16, 1), (16, 32, 2), (32, 64, 2)]
    convs, lins = [], []
    for cin, cout, stride in cfgs:
        key, k1, k2 = jax.random.split(key, 3)
        convs.append(dict(
            w=0.1 * jax.random.normal(k1, (cout, cin, 3, 3), jnp.float32),
            stride=stride))
        lins.append(jnp.abs(0.1 * jax.random.normal(k2, (cout,), jnp.float32)))
    return dict(convs=convs, lins=lins)


def _lpips_features(params, x_nhwc):
    h = (x_nhwc - _LPIPS_SHIFT) / _LPIPS_SCALE
    feats = []
    for p in params['convs']:
        Cout = p['w'].shape[0]
        # ReLU fused into the matmul epilogue (slope=0).
        out, (NB, OH, OW) = conv2d_fused(
            h, p['w'], p['stride'], 1,
            jnp.ones((Cout,), jnp.float32), jnp.zeros((Cout,), jnp.float32),
            0.0)
        h = out.reshape(NB, OH, OW, Cout)
        feats.append(h)
    return feats


def lpips_pair(params, x_nhwc, y_nhwc):
    """Runs the trunk once on concat([x, y]) and returns (N,1,1,1) p_loss."""
    N = x_nhwc.shape[0]
    both = jnp.concatenate([x_nhwc, y_nhwc], axis=0)
    feats = _lpips_features(params, both)
    total = jnp.zeros((N, 1), jnp.float32)
    for f, lin in zip(feats, params['lins']):
        total = total + lpips_stage(f[:N], f[N:], lin)
    return total.reshape(N, 1, 1, 1)


# ----------------------------------------------------------------------------
# Loss helpers
# ----------------------------------------------------------------------------
def adopt_weight(weight, global_step, threshold=0, value=0.0):
    # jit/trace-safe (no Python branch on a possibly-traced global_step).
    return jnp.where(jnp.asarray(global_step) < threshold,
                     jnp.asarray(value, jnp.float32),
                     jnp.asarray(weight, jnp.float32))


def hinge_d_loss(logits_real, logits_fake):
    loss_real = jnp.mean(jax.nn.relu(1.0 - logits_real))
    loss_fake = jnp.mean(jax.nn.relu(1.0 + logits_fake))
    return 0.5 * (loss_real + loss_fake)


def vanilla_d_loss(logits_real, logits_fake):
    return 0.5 * (jnp.mean(jax.nn.softplus(-logits_real)) +
                  jnp.mean(jax.nn.softplus(logits_fake)))


class DiagonalGaussianDistribution:
    def __init__(self, parameters):
        self.parameters = parameters
        mean, logvar = jnp.split(parameters, 2, axis=1)
        self.mean = mean
        self.logvar = jnp.clip(logvar, -30.0, 20.0)

    def kl(self):
        return kl_per_sample(self.mean, self.logvar)  # (N,)


# ----------------------------------------------------------------------------
# LPIPSWithDiscriminator_KL
# ----------------------------------------------------------------------------
class LPIPSWithDiscriminatorKL:
    def __init__(self, disc_start, key, logvar_init=0.0, kl_weight=1.0,
                 pixelloss_weight=1.0, disc_num_layers=3, disc_in_channels=3,
                 disc_factor=1.0, disc_weight=1.0, perceptual_weight=1.0,
                 disc_conditional=False, disc_loss='hinge'):
        assert disc_loss in ['hinge', 'vanilla']
        k_lpips, k_disc = jax.random.split(key)
        self.kl_weight = kl_weight
        self.pixel_weight = pixelloss_weight
        self.perceptual_weight = perceptual_weight
        self.logvar = jnp.asarray(logvar_init, jnp.float32)   # nn.Parameter(())
        self.lpips_params = init_lpips_params(k_lpips)
        self.disc_params = init_discriminator_params(
            k_disc, input_nc=disc_in_channels, ndf=64, n_layers=disc_num_layers)
        self.discriminator_iter_start = disc_start
        self.disc_factor = disc_factor
        self.discriminator_weight = disc_weight
        self.disc_conditional = disc_conditional
        self.disc_loss = hinge_d_loss if disc_loss == 'hinge' else vanilla_d_loss

    def calculate_adaptive_weight(self, nll_grads, g_grads):
        d_weight = jnp.linalg.norm(nll_grads) / (jnp.linalg.norm(g_grads) + 1e-4)
        d_weight = jnp.clip(d_weight, 0.0, 1e4)
        return d_weight * self.discriminator_weight

    def forward(self, inputs, reconstructions, posteriors, optimizer_idx,
                global_step, last_layer_grads=None, cond=None, split='train',
                weights=None):
        # inputs / reconstructions: NCHW float32 (PyTorch convention)
        x = jnp.transpose(inputs, (0, 2, 3, 1)).astype(jnp.float32)
        xr = jnp.transpose(reconstructions, (0, 2, 3, 1)).astype(jnp.float32)
        N = x.shape[0]
        per_sample_elems = x.size // N
        numel = x.size

        # rec_loss = |x - xr| + pw * p_loss  (p_loss broadcasts per sample), so
        # sum(rec) = sum|x - xr| + pw * sum_n p_loss[n] * (C*H*W) and
        # sum(nll) = sum(rec)/exp(logvar) + logvar * numel.
        abs_sum = abs_diff_sum(x, xr)
        if self.perceptual_weight > 0:
            p_loss = lpips_pair(self.lpips_params, x, xr)      # (N,1,1,1)
            p_sum = jnp.sum(p_loss)
        else:
            p_sum = jnp.asarray(0.0, jnp.float32)
        rec_sum = abs_sum + self.perceptual_weight * p_sum * per_sample_elems
        lv = self.logvar
        nll_sum = rec_sum / jnp.exp(lv) + lv * numel
        nll_loss = nll_sum / N
        rec_loss_mean = rec_sum / numel

        weighted_nll_loss = nll_loss
        if weights is not None:
            w = jnp.asarray(weights, jnp.float32)
            # TODO(synk): per-element `weights` needs an elementwise NLL pass;
            # only scalar weights are supported by the fused reduction path.
            assert w.ndim == 0
            weighted_nll_loss = w * nll_loss

        kl = posteriors.kl()                                   # (N,)
        kl_loss = jnp.sum(kl) / kl.shape[0]

        if optimizer_idx == 0:
            assert cond is None and not self.disc_conditional
            logits_fake = discriminator_forward(self.disc_params, [xr])[0]
            g_loss = -jnp.mean(logits_fake)
            if self.disc_factor > 0.0:
                if last_layer_grads is not None:
                    # TODO(synk): torch.autograd.grad w.r.t. the external decoder
                    # last layer has no self-contained equivalent; the grads are
                    # supplied by the caller instead.
                    d_weight = self.calculate_adaptive_weight(*last_layer_grads)
                else:
                    d_weight = jnp.asarray(0.0, jnp.float32)   # RuntimeError fallback
            else:
                d_weight = jnp.asarray(0.0, jnp.float32)
            disc_factor = adopt_weight(self.disc_factor, global_step,
                                       threshold=self.discriminator_iter_start)
            loss = (weighted_nll_loss + self.kl_weight * kl_loss
                    + d_weight * disc_factor * g_loss)
            log = {
                f'{split}/total_loss': loss,
                f'{split}/logvar': self.logvar,
                f'{split}/kl_loss': kl_loss,
                f'{split}/nll_loss': nll_loss,
                f'{split}/rec_loss': rec_loss_mean,
                f'{split}/d_weight': d_weight,
                f'{split}/disc_factor': disc_factor,
                f'{split}/g_loss': g_loss,
            }
            return loss, log

        if optimizer_idx == 1:
            assert cond is None
            # One concatenated conv pass; BN stats still computed per input.
            logits_real, logits_fake = discriminator_forward(
                self.disc_params, [x, xr])
            disc_factor = adopt_weight(self.disc_factor, global_step,
                                       threshold=self.discriminator_iter_start)
            d_loss = disc_factor * self.disc_loss(logits_real, logits_fake)
            log = {
                f'{split}/disc_loss': d_loss,
                f'{split}/logits_real': jnp.mean(logits_real),
                f'{split}/logits_fake': jnp.mean(logits_fake),
            }
            return d_loss, log


if __name__ == "__main__":
    key = jax.random.PRNGKey(0)
    k_params, k_in, k_rec, k_post, k_g1, k_g2 = jax.random.split(key, 6)

    B, C, H, W = 2, 3, 32, 32
    inputs = jax.random.normal(k_in, (B, C, H, W), jnp.float32)
    recons = jax.random.normal(k_rec, (B, C, H, W), jnp.float32)
    # posterior moments: (N, 2*z, h, w) -> DiagonalGaussianDistribution
    post_params = jax.random.normal(k_post, (B, 8, 8, 8), jnp.float32)
    posteriors = DiagonalGaussianDistribution(post_params)
    # synthetic "decoder last layer" gradients for the adaptive weight
    nll_grads = jax.random.normal(k_g1, (3, 128, 3, 3), jnp.float32)
    g_grads = jax.random.normal(k_g2, (3, 128, 3, 3), jnp.float32)

    module = LPIPSWithDiscriminatorKL(disc_start=50, key=k_params)

    loss0, log0 = module.forward(inputs, recons, posteriors,
                                 optimizer_idx=0, global_step=100,
                                 last_layer_grads=(nll_grads, g_grads))
    jax.block_until_ready(loss0)

    loss1, log1 = module.forward(inputs, recons, posteriors,
                                 optimizer_idx=1, global_step=100)
    jax.block_until_ready(loss1)

    print("KERNEL_OK")
</pallas_src>

<mosaic_0001>
module attributes {stable_mosaic.version = 11 : i64} {
  func.func @_absdiff_kernel(%arg0: i32, %arg1: memref<16x512xf32, #tpu.memory_space<vmem>>, %arg2: memref<16x512xf32, #tpu.memory_space<vmem>>, %arg3: memref<1x1xf32, #tpu.memory_space<vmem>>) attributes {dimension_semantics = [#tpu.dimension_semantics<arbitrary>], iteration_bounds = array<i64: 1>, scalar_prefetch = 0 : i64, scratch_operands = 0 : i64, tpu.core_type = #tpu.core_type<tc>, window_params = [{transform_indices = @transform_0, window_bounds = array<i64: 16, 512>}, {transform_indices = @transform_1, window_bounds = array<i64: 16, 512>}, {pipeline_mode = #tpu.pipeline_mode<synchronous>, transform_indices = @transform_2, window_bounds = array<i64: 1, 1>}]} {
    %c0_i32 = arith.constant 0 : i32
    %0 = arith.cmpi eq, %arg0, %c0_i32 : i32
    %1 = arith.extui %0 : i1 to i32
    %c0_i32_0 = arith.constant 0 : i32
    %2 = arith.cmpi ne, %1, %c0_i32_0 : i32
    scf.if %2 {
      %cst_8 = arith.constant 0.000000e+00 : f32
      %15 = vector.broadcast %cst_8 : f32 to vector<1x1xf32>
      %c0_9 = arith.constant 0 : index
      %c0_10 = arith.constant 0 : index
      %16 = vector.load %arg3[%c0_9, %c0_10] : memref<1x1xf32, #tpu.memory_space<vmem>>, vector<1x1xf32>
      tpu.vector_store %arg3[%c0_9, %c0_10], %15 {strides = array<i32>} : memref<1x1xf32, #tpu.memory_space<vmem>>, vector<1x1xf32>,
    } else {
    }
    %c0 = arith.constant 0 : index
    %c0_1 = arith.constant 0 : index
    %3 = vector.load %arg3[%c0, %c0_1] : memref<1x1xf32, #tpu.memory_space<vmem>>, vector<1x1xf32>
    %c0_2 = arith.constant 0 : index
    %c0_3 = arith.constant 0 : index
    %4 = vector.load %arg1[%c0_2, %c0_3] : memref<16x512xf32, #tpu.memory_space<vmem>>, vector<16x512xf32>
    %c0_4 = arith.constant 0 : index
    %c0_5 = arith.constant 0 : index
    %5 = vector.load %arg2[%c0_4, %c0_5] : memref<16x512xf32, #tpu.memory_space<vmem>>, vector<16x512xf32>
    %6 = arith.subf %4, %5 : vector<16x512xf32>
    %7 = math.absf %6 : vector<16x512xf32>
    %8 = vector.shape_cast %7 : vector<16x512xf32> to vector<1x16x512xf32>
    %cst = arith.constant dense<0.000000e+00> : vector<1xf32>
    %9 = vector.multi_reduction <add>, %8, %cst [1, 2] : vector<1x16x512xf32> to vector<1xf32>
    %10 = vector.shape_cast %9 : vector<1xf32> to vector<1x1x1xf32>
    %11 = vector.extract %10[0, 0, 0] : f32 from vector<1x1x1xf32>
    %12 = vector.broadcast %11 : f32 to vector<1x1xf32>
    %13 = arith.addf %3, %12 : vector<1x1xf32>
    %c0_6 = arith.constant 0 : index
    %c0_7 = arith.constant 0 : index
    %14 = vector.load %arg3[%c0_6, %c0_7] : memref<1x1xf32, #tpu.memory_space<vmem>>, vector<1x1xf32>
    tpu.vector_store %arg3[%c0_6, %c0_7], %13 {strides = array<i32>} : memref<1x1xf32, #tpu.memory_space<vmem>>, vector<1x1xf32>,
    return
  }
  func.func @transform_0(%arg0: i32) -> (i32, i32) {
    %c0_i32 = arith.constant 0 : i32
    %c0_i32_0 = arith.constant 0 : i32
    return %arg0, %c0_i32 : i32, i32
  }
  func.func @transform_1(%arg0: i32) -> (i32, i32) {
    %c0_i32 = arith.constant 0 : i32
    %c0_i32_0 = arith.constant 0 : i32
    return %arg0, %c0_i32 : i32, i32
  }
  func.func @transform_2(%arg0: i32) -> (i32, i32) {
    %c0_i32 = arith.constant 0 : i32
    %c0_i32_0 = arith.constant 0 : i32
    %c0_i32_1 = arith.constant 0 : i32
    return %c0_i32, %c0_i32_0 : i32, i32
  }
}

</mosaic_0001>

<bundles_post_ra>
// kernel: tpu_custom_call.1
= control target key start
LH: loop header
LB: loop body
LE: loop exit
PB: predicated region body
PF: predicated region fallthrough
CT: control target
= control target key end

     0   :  { %7 = vsyncpa [#allocation3], 0  ;;  %s254_s0 = inlined_call_operand.hbm [shape: f32[16,512], index: 0, kind: input, shape index: {}]   ;;  %s255_s1 = inlined_call_operand.hbm [shape: f32[16,512], index: 1, kind: input, shape index: {}]   ;;  %s256_s2 = inlined_call_operand.hbm [shape: f32[1,1], index: 2, kind: output, shape index: {}]  }
   0x1   :  { %8 = vsyncpa [#allocation6], 0 }
   0x2   :  { %9 = vsyncpa [#allocation4], 0  ;;  %s195_s9 = smov [#allocation2]   ;;  %s123_s13 = scalar_lea.hbm %s254_s0, 1024 }
   0x3   :  { %s15_s10 = sshll.u32 %s195_s9, 4  ;;  %p124_p0 = scmp.ne.s32.totalorder %s254_s0, %s123_s13  ;;  %s16_s10 = int_to_ptr.vmem [resolvable:$true] %s15_s10 }
   0x4   :  { %p127_p1 = scmp.lt.u32.totalorder %s123_s13, %s254_s0 }
   0x6   :  { %p129_p2 = pnand %p127_p1, %p124_p0 }
   0x8   :  { %132 = shalt.err (!%p129_p2)
}
   0x9   :  { %s133_s18 = scalar_lea.vmem %s16_s10, 1024  ;;  %p138_p4 = scmp.lt.s32.totalorder %s16_s10, %s16_s10 }
   0xa   :  { %p134_p3 = scmp.ne.s32.totalorder %s16_s10, %s133_s18  ;;  %p139_p5 = scmp.lt.s32.totalorder %s133_s18, %s133_s18 }
   0xc   :  { %p140_p6 = por %p139_p5, %p138_p4 }
   0xe   :  { %p141_p7 = pnand %p140_p6, %p134_p3 }
  0x10   :  { %144 = shalt.err (!%p141_p7)
}
  0x11   :  { %s196_s19 = smov 512   ;;  %s197_s20 = smov 32  }
  0x12   :  { %21 = dma.hbm_to_vmem [thread:$0]  %s254_s0, 1024, %s16_s10, [#allocation3], %s196_s19, %s196_s19, %s197_s20  }
  0x13   :  { %s198_s23 = smov [#allocation5]   ;;  %s145_s27 = scalar_lea.hbm %s255_s1, 1024 }
  0x14   :  { %s27_s24 = sshll.u32 %s198_s23, 4  ;;  %p146_p8 = scmp.ne.s32.totalorder %s255_s1, %s145_s27  ;;  %s28_s24 = int_to_ptr.vmem [resolvable:$true] %s27_s24 }
  0x15   :  { %p149_p9 = scmp.lt.u32.totalorder %s145_s27, %s255_s1 }
  0x17   :  { %p151_p10 = pnand %p149_p9, %p146_p8 }
  0x19   :  { %154 = shalt.err (!%p151_p10)
}
  0x1a   :  { %s155_s4 = scalar_lea.vmem %s28_s24, 1024  ;;  %p160_p12 = scmp.lt.s32.totalorder %s28_s24, %s28_s24 }
  0x1b   :  { %p156_p11 = scmp.ne.s32.totalorder %s28_s24, %s155_s4  ;;  %p161_p13 = scmp.lt.s32.totalorder %s155_s4, %s155_s4 }
  0x1d   :  { %p162_p0 = por %p161_p13, %p160_p12 }
  0x1f   :  { %p163_p1 = pnand %p162_p0, %p156_p11 }
  0x21   :  { %166 = shalt.err (!%p163_p1)
}
  0x22   :  { %33 = dma.hbm_to_vmem [thread:$0]  %s255_s1, 1024, %s28_s24, [#allocation6], %s196_s19, %s196_s19, %s197_s20  }
  0x23   :  { %189 = dma.done.wait [#allocation3], 1024  }
  0x24   :  { %190 = vsyncadd [#allocation3], 4294966272 }
  0x25   :  { %191 = dma.done.wait [#allocation6], 1024  }
  0x26   :  { %192 = vsyncadd [#allocation6], 4294966272  ;;  %v47_v0 = vld [vmem:[#allocation2] sm:$0xff]  ;;  %v48_v1 = vld [vmem:[#allocation2 + $0x8] sm:$0xff]  ;;  %vm44_vm0 = vcmask 0   ;;  %v199_v39 = vmov 0.0  }
  0x27   :  { %v49_v2 = vld [vmem:[#allocation2 + $0x10] sm:$0xff]  ;;  %v50_v3 = vld [vmem:[#allocation2 + $0x18] sm:$0xff]  ;;  %v51_v4 = vld [vmem:[#allocation2 + $0x20] sm:$0xff]  ;;  %45 = vst.msk [vmem:[#allocation7] sm:$0x1] %vm44_vm0, %v199_v39  ;;  %s200_s1 = smov [#allocation7]  }
  0x28   :  { %v55_v5 = vld [vmem:[#allocation5] sm:$0xff]  ;;  %v56_v6 = vld [vmem:[#allocation5 + $0x8] sm:$0xff]  ;;  %v57_v7 = vld [vmem:[#allocation5 + $0x10] sm:$0xff]  ;;  %s105_s6 = sshll.u32 %s200_s1, 4  ;;  %s106_s6 = int_to_ptr.vmem [resolvable:$true] %s105_s6 }
  0x29   :  { %v58_v8 = vld [vmem:[#allocation5 + $0x18] sm:$0xff]  ;;  %v63_v9 = vsub.f32 %v47_v0, %v55_v5  ;;  %v59_v10 = vld [vmem:[#allocation5 + $0x20] sm:$0xff]  ;;  %v64_v11 = vsub.f32 %v48_v1, %v56_v6  ;;  %v65_v12 = vsub.f32 %v49_v2, %v57_v7  ;;  %v52_v14 = vld [vmem:[#allocation2 + $0x28] sm:$0xff]  ;;  %s167_s8 = scalar_lea.vmem %s106_s6, 16  ;;  %s171_s9 = scalar_lea.vmem %s106_s6, 32 }
  0x2a   :  { %v66_v13 = vsub.f32 %v50_v3, %v58_v8  ;;  %v60_v15 = vld [vmem:[#allocation5 + $0x28] sm:$0xff]  ;;  %v67_v17 = vsub.f32 %v51_v4, %v59_v10  ;;  %v53_v20 = vld [vmem:[#allocation2 + $0x30] sm:$0xff]  ;;  %v54_v25 = vld [vmem:[#allocation2 + $0x38] sm:$0xff]  ;;  %p168_p2 = scmp.ne.s32.totalorder %s106_s6, %s167_s8  ;;  %p172_p3 = scmp.lt.s32.totalorder %s106_s6, %s106_s6 }
  0x2b   :  { %v71_v16 = vand.u32 2147483647, %v63_v9  ;;  %v72_v18 = vand.u32 2147483647, %v64_v11  ;;  %v73_v19 = vand.u32 2147483647, %v65_v12  ;;  %v68_v22 = vsub.f32 %v52_v14, %v60_v15  ;;  %p173_p4 = scmp.lt.s32.totalorder %s171_s9, %s167_s8 }
  0x2c   :  { %v61_v21 = vld [vmem:[#allocation5 + $0x30] sm:$0xff]  ;;  %v74_v23 = vand.u32 2147483647, %v66_v13  ;;  %v62_v26 = vld [vmem:[#allocation5 + $0x38] sm:$0xff]  ;;  %v75_v28 = vand.u32 2147483647, %v67_v17 }
  0x2d   :  { %v79_v24 = vadd.f32 %v72_v18, %v71_v16  ;;  %v69_v27 = vsub.f32 %v53_v20, %v61_v21  ;;  %v70_v30 = vsub.f32 %v54_v25, %v62_v26  ;;  %v76_v31 = vand.u32 2147483647, %v68_v22  ;;  %p174_p5 = por %p173_p4, %p172_p3 }
  0x2e   :  { %v46_v47 = vld [vmem:[#allocation7] sm:$0x1] }
  0x2f   :  { %v80_v29 = vadd.f32 %v79_v24, %v73_v19  ;;  %v77_v33 = vand.u32 2147483647, %v69_v27  ;;  %v78_v35 = vand.u32 2147483647, %v70_v30  ;;  %p175_p6 = pnand %p174_p5, %p168_p2 }
  0x31   :  { %v81_v32 = vadd.f32 %v80_v29, %v74_v23 }
  0x33   :  { %v82_v34 = vadd.f32 %v81_v32, %v75_v28 }
  0x35   :  { %v83_v36 = vadd.f32 %v82_v34, %v76_v31 }
  0x37   :  { %v84_v37 = vadd.f32 %v83_v36, %v77_v33 }
  0x39   :  { %v85_v38 = vadd.f32 %v84_v37, %v78_v35 }
  0x3b   :  { %86 = vadd.xlane.f32.xlu0 %v85_v38 }
  0xc8   :  { %v87_v40 = vpop.xlane.xlu0 %86 }
  0xc9   :  { %v88_v41 = vrot.slane %v87_v40, 4 }
  0xcb   :  { %v89_v42 = vadd.f32 %v88_v41, %v87_v40 }
  0xcd   :  { %v90_v43 = vrot.slane %v89_v42, 2 }
  0xcf   :  { %v91_v44 = vadd.f32 %v90_v43, %v89_v42 }
  0xd1   :  { %v92_v45 = vrot.slane %v91_v44, 1 }
  0xd3   :  { %v93_v46 = vadd.f32 %v92_v45, %v91_v44 }
  0xd5   :  { %115 = vpush %v93_v46 }
 0x106   :  { %s116_s7 = spop %115 }
 0x107   :  { %v95_v48 = vstv %s116_s7 }
 0x108   :  { %v96_v49 = vadd.f32 %v95_v48, %v46_v47 }
 0x10a   :  { %98 = vst.msk [vmem:[#allocation7] sm:$0x1] %vm44_vm0, %v96_v49 }
 0x10b   :  { %178 = shalt.err (!%p175_p6)
}
 0x10c   :  { %s179_s12 = scalar_lea.hbm %s256_s2, 16 }
 0x10d   :  { %p180_p7 = scmp.ne.s32.totalorder %s256_s2, %s179_s12  ;;  %p183_p8 = scmp.lt.u32.totalorder %s179_s12, %s256_s2 }
 0x10f   :  { %p185_p9 = pnand %p183_p8, %p180_p7 }
 0x111   :  { %188 = shalt.err (!%p185_p9)
}
 0x112   :  { %108 = dma.vmem_to_hbm [thread:$0]  %s106_s6, 16, %s256_s2, [#allocation4]  }
 0x113   :  { %193 = dma.done.wait [#allocation4], 16  }
 0x114   :  { %194 = vsyncadd [#allocation4], 4294967280 }
 0x115   :  { %112 = vsyncpa [#allocation3], 1 }
 0x116   :  { %113 = vsyncpa [#allocation6], 1 }
 0x117   :  { %114 = vsyncpa [#allocation4], 1 }

</bundles_post_ra>
